<compile_context>
chip_gen: v7x
topology: tpu7x:2x2x1
jax: 0.10.0
libtpu: 0.0.40
codegen_flags: <defaults>
</compile_context>

<pallas_src>
import math

import jax
import jax.numpy as jnp
from jax.experimental import pallas as pl
from jax.experimental.pallas import tpu as pltpu


# ---------------------------------------------------------------------------
# Nonlinearity dispatch (static, trace-time) — mirrors nl_selector / SymReLU.
# ---------------------------------------------------------------------------
def _apply_nl(a, nl):
    if nl in (None, "identity"):
        return a
    if nl == "relu":
        return jnp.maximum(a, 0.0)
    if nl == "tanh":
        return jnp.tanh(a)
    if nl == "sigmoid":
        return jax.nn.sigmoid(a)
    if nl == "symrelu":            # relu(threshold - |x|), threshold = 1
        return jnp.maximum(1.0 - jnp.abs(a), 0.0)
    raise ValueError(f"unknown nonlinearity: {nl}")


# ---------------------------------------------------------------------------
# Kernel: one (tm, tn) output tile; reduction over hidden may be K-tiled.
#   k == 0     : acc  = x @ U
#   every k    : acc += h_k @ W_k
#   k == last  : out  = nl(acc)
# ---------------------------------------------------------------------------
def _rnn_step_kernel(nl):
    def kernel(h_ref, w_ref, x_ref, u_ref, o_ref, acc_ref):
        k = pl.program_id(2)

        @pl.when(k == 0)
        def _():
            acc_ref[...] = jnp.dot(x_ref[...], u_ref[...],
                                   preferred_element_type=jnp.float32)

        acc_ref[...] += jnp.dot(h_ref[...], w_ref[...],
                                preferred_element_type=jnp.float32)

        @pl.when(k == pl.num_programs(2) - 1)
        def _():
            o_ref[...] = _apply_nl(acc_ref[...], nl).astype(o_ref.dtype)

    return kernel


# ---------------------------------------------------------------------------
# Tiling helpers.
# ---------------------------------------------------------------------------
def _sublane_unit(dtype):
    # Native packed sublane tile: f32 -> 8, bf16 -> 16, int8/fp8 -> 32.
    return {4: 8, 2: 16, 1: 32}.get(jnp.dtype(dtype).itemsize, 8)


def _pick_tile(dim, unit, max_tile):
    """Largest tile <= max_tile that is either the full dim or a multiple of
    `unit` that divides `dim` (keeps every block (8,128)/packing legal)."""
    if dim <= max_tile:
        return dim
    t = (max_tile // unit) * unit
    while t >= unit:
        if dim % t == 0:
            return t
        t -= unit
    return dim  # no nice divisor: single block along this axis


def _shrink_tile(dim, unit, cur):
    """Next smaller legal tile below `cur`, or `cur` if none exists."""
    if cur <= unit:
        return cur
    t = _pick_tile(dim, unit, max(unit, cur // 2))
    return t if t < cur else cur


def _vmem_capacity_bytes():
    try:
        return int(pltpu.get_tpu_info().vmem_capacity_bytes)
    except Exception:
        return 64 * 1024 * 1024   # conservative: v7x per-TC VMEM (smallest gen)


# ---------------------------------------------------------------------------
# Wrapper: PlainRNN.forward
# ---------------------------------------------------------------------------
def plain_rnn_step(x, h, W, U, *, nl="relu", tm_max=512, tn_max=512,
                   vmem_budget_bytes=None):
    """Pallas TPU implementation of PlainRNN.forward: nl(h @ W + x @ U).

    x: (batch, input_size), h: (batch, hidden_size)
    W: (hidden_size, hidden_size), U: (input_size, hidden_size)
    returns: (batch, hidden_size), dtype of h.
    """
    B, I = x.shape
    Bh, H = h.shape
    assert Bh == B and W.shape == (H, H) and U.shape == (I, H)

    out_dtype = h.dtype
    out_isz = jnp.dtype(out_dtype).itemsize
    isz = lambda a: jnp.dtype(a.dtype).itemsize
    unit_m = _sublane_unit(h.dtype)

    # --- tile selection ----------------------------------------------------
    tm = _pick_tile(B, unit_m, tm_max)    # batch tile (sublane dim of h/x/out)
    tn = _pick_tile(H, 128, tn_max)       # output-hidden tile (lane dim)
    tk = H                                # reduction tile over hidden (full-K default)

    # Expose >=2 parallel grid cells when possible (v7x has 2 TensorCores).
    if (B // tm) * (H // tn) == 1:
        if H >= 256:
            tn2 = _pick_tile(H, 128, max(128, H // 2))
            if tn2 < H:
                tn = tn2
        elif B >= 2 * unit_m:
            tm2 = _pick_tile(B, unit_m, max(unit_m, B // 2))
            if tm2 < B:
                tm = tm2

    # --- VMEM budget: shrink K (keeps tn lane-dense), then tn, then tm ------
    vmem_physical = _vmem_capacity_bytes()
    budget = int(0.70 * vmem_physical) if vmem_budget_bytes is None \
        else int(vmem_budget_bytes)

    def footprint(tm_, tn_, tk_):
        blocks = (tm_ * tk_ * isz(h) + tk_ * tn_ * isz(W) +
                  tm_ * I * isz(x) + I * tn_ * isz(U) +
                  tm_ * tn_ * out_isz)
        return 2 * blocks + tm_ * tn_ * 4      # 2x double-buffering + f32 acc

    for _ in range(64):
        if footprint(tm, tn, tk) <= budget:
            break
        new_tk = _shrink_tile(H, 128, tk)
        if new_tk < tk:
            tk = new_tk
            continue
        new_tn = _shrink_tile(H, 128, tn)
        if new_tn < tn:
            tn = new_tn
            continue
        new_tm = _shrink_tile(B, unit_m, tm)
        if new_tm < tm:
            tm = new_tm
            continue
        break  # cannot shrink further; rely on the raised vmem_limit below

    gm, gn, gk = B // tm, H // tn, H // tk

    fp = footprint(tm, tn, tk)
    vmem_limit = None
    if fp > 12 * 1024 * 1024:   # default scoped VMEM is tight on some gens
        vmem_limit = int(min(0.9 * vmem_physical,
                             max(2 * fp, 32 * 1024 * 1024)))

    # Grid order: j (output tile) outermost, i (batch tile) in the middle,
    # k (reduction) innermost.  Because i varies faster than j, the W and U
    # block indices are unchanged across consecutive steps of the i sweep, so
    # Pallas skips their HBM re-reads: weights stream from HBM once per j.
    grid_spec = pltpu.PrefetchScalarGridSpec(
        num_scalar_prefetch=0,
        grid=(gn, gm, gk),
        in_specs=[
            pl.BlockSpec((tm, tk), lambda j, i, k: (i, k)),   # h
            pl.BlockSpec((tk, tn), lambda j, i, k: (k, j)),   # W
            pl.BlockSpec((tm, I),  lambda j, i, k: (i, 0)),   # x
            pl.BlockSpec((I, tn),  lambda j, i, k: (0, j)),   # U
        ],
        out_specs=pl.BlockSpec((tm, tn), lambda j, i, k: (i, j)),
        scratch_shapes=[pltpu.VMEM((tm, tn), jnp.float32)],
    )

    flops = 2 * B * H * H + 2 * B * I * H
    transcendentals = B * H if nl in ("tanh", "sigmoid") else 0
    bytes_accessed = (h.size * isz(h) + W.size * isz(W) + x.size * isz(x)
                      + U.size * isz(U) + B * H * out_isz)

    return pl.pallas_call(
        _rnn_step_kernel(nl),
        out_shape=jax.ShapeDtypeStruct((B, H), out_dtype),
        grid_spec=grid_spec,
        compiler_params=pltpu.CompilerParams(
            dimension_semantics=("parallel", "parallel", "arbitrary"),
            vmem_limit_bytes=vmem_limit),
        cost_estimate=pl.CostEstimate(
            flops=flops,
            transcendentals=transcendentals,
            bytes_accessed=bytes_accessed),
    )(h, W, x, U)


def plain_rnn_step_ref(x, h, W, U, nl="relu"):
    return _apply_nl(jnp.dot(h, W) + jnp.dot(x, U), nl)


if __name__ == "__main__":
    key = jax.random.PRNGKey(0)
    k1, k2, k3, k4 = jax.random.split(key, 4)

    # Small shapes consistent with PlainRNN.forward.
    batch, input_size, hidden_size, g = 2, 8, 32, 1.0

    x = jax.random.normal(k1, (batch, input_size), dtype=jnp.float32)
    h = jax.random.normal(k2, (batch, hidden_size), dtype=jnp.float32)
    # Match PyTorch init: W ~ N(0, g/sqrt(hidden)), U ~ N(0, 1)
    W = (g / math.sqrt(hidden_size)) * jax.random.normal(
        k3, (hidden_size, hidden_size), dtype=jnp.float32)
    U = jax.random.normal(k4, (input_size, hidden_size), dtype=jnp.float32)

    # Default PlainRNN nonlinearity (ReLU), single fused kernel, grid (1,1,1).
    y = jax.block_until_ready(plain_rnn_step(x, h, W, U, nl="relu"))
    y_ref = plain_rnn_step_ref(x, h, W, U, nl="relu")
    assert y.shape == (batch, hidden_size) and y.dtype == jnp.float32
    assert jnp.allclose(y, y_ref, atol=1e-4, rtol=1e-4)

    # Another supported nonlinearity through the same fused kernel.
    y2 = jax.block_until_ready(plain_rnn_step(x, h, W, U, nl="tanh"))
    assert jnp.allclose(y2, plain_rnn_step_ref(x, h, W, U, nl="tanh"),
                        atol=1e-4, rtol=1e-4)

    # Multi-tile grid (gn=2): exercises weight-resident / parallel-split path.
    b2, i2, h2 = 16, 8, 256
    x2 = jax.random.normal(k1, (b2, i2), dtype=jnp.float32)
    hh = jax.random.normal(k2, (b2, h2), dtype=jnp.float32)
    W2 = (1.0 / math.sqrt(h2)) * jax.random.normal(k3, (h2, h2),
                                                   dtype=jnp.float32)
    U2 = jax.random.normal(k4, (i2, h2), dtype=jnp.float32)
    y3 = jax.block_until_ready(plain_rnn_step(x2, hh, W2, U2, nl="relu"))
    assert jnp.allclose(y3, plain_rnn_step_ref(x2, hh, W2, U2, nl="relu"),
                        atol=1e-3, rtol=1e-3)

    # Force a tiny VMEM budget to exercise the K-tiled accumulator path (gk>1).
    y4 = jax.block_until_ready(
        plain_rnn_step(x2, hh, W2, U2, nl="relu", vmem_budget_bytes=250_000))
    assert jnp.allclose(y4, plain_rnn_step_ref(x2, hh, W2, U2, nl="relu"),
                        atol=1e-3, rtol=1e-3)

    print("KERNEL_OK")
</pallas_src>

<mosaic_0001>
module attributes {stable_mosaic.version = 11 : i64} {
  func.func @kernel(%arg0: i32, %arg1: i32, %arg2: i32, %arg3: memref<2x32xf32, #tpu.memory_space<vmem>>, %arg4: memref<32x32xf32, #tpu.memory_space<vmem>>, %arg5: memref<2x8xf32, #tpu.memory_space<vmem>>, %arg6: memref<8x32xf32, #tpu.memory_space<vmem>>, %arg7: memref<2x32xf32, #tpu.memory_space<vmem>>, %arg8: memref<2x32xf32, #tpu.memory_space<vmem>>) attributes {dimension_semantics = [#tpu.dimension_semantics<parallel>, #tpu.dimension_semantics<parallel>, #tpu.dimension_semantics<arbitrary>], iteration_bounds = array<i64: 1, 1, 1>, scalar_prefetch = 0 : i64, scratch_operands = 1 : i64, tpu.core_type = #tpu.core_type<tc>, window_params = [{transform_indices = @transform_0, window_bounds = array<i64: 2, 32>}, {transform_indices = @transform_1, window_bounds = array<i64: 32, 32>}, {transform_indices = @transform_2, window_bounds = array<i64: 2, 8>}, {transform_indices = @transform_3, window_bounds = array<i64: 8, 32>}, {transform_indices = @transform_4, window_bounds = array<i64: 2, 32>}]} {
    %c0_i32 = arith.constant 0 : i32
    %0 = arith.cmpi eq, %arg2, %c0_i32 : i32
    %1 = arith.extui %0 : i1 to i32
    %c0_i32_0 = arith.constant 0 : i32
    %2 = arith.cmpi ne, %1, %c0_i32_0 : i32
    scf.if %2 {
      %c0_10 = arith.constant 0 : index
      %c0_11 = arith.constant 0 : index
      %12 = vector.load %arg5[%c0_10, %c0_11] : memref<2x8xf32, #tpu.memory_space<vmem>>, vector<2x8xf32>
      %c0_12 = arith.constant 0 : index
      %c0_13 = arith.constant 0 : index
      %13 = vector.load %arg6[%c0_12, %c0_13] : memref<8x32xf32, #tpu.memory_space<vmem>>, vector<8x32xf32>
      %cst_14 = arith.constant dense<0.000000e+00> : vector<2x32xf32>
      %14 = tpu.matmul %12, %13, %cst_14 {dimension_numbers = #tpu.dot_dimension_numbers<[1], [0], [0], [1], [0, 0, 1, 1], [], []>} : vector<2x8xf32>, vector<8x32xf32>, vector<2x32xf32> -> vector<2x32xf32>
      %c0_15 = arith.constant 0 : index
      %c0_16 = arith.constant 0 : index
      %15 = vector.load %arg8[%c0_15, %c0_16] : memref<2x32xf32, #tpu.memory_space<vmem>>, vector<2x32xf32>
      tpu.vector_store %arg8[%c0_15, %c0_16], %14 {strides = array<i32>} : memref<2x32xf32, #tpu.memory_space<vmem>>, vector<2x32xf32>,
    } else {
    }
    %c0 = arith.constant 0 : index
    %c0_1 = arith.constant 0 : index
    %3 = vector.load %arg8[%c0, %c0_1] : memref<2x32xf32, #tpu.memory_space<vmem>>, vector<2x32xf32>
    %c0_2 = arith.constant 0 : index
    %c0_3 = arith.constant 0 : index
    %4 = vector.load %arg3[%c0_2, %c0_3] : memref<2x32xf32, #tpu.memory_space<vmem>>, vector<2x32xf32>
    %c0_4 = arith.constant 0 : index
    %c0_5 = arith.constant 0 : index
    %5 = vector.load %arg4[%c0_4, %c0_5] : memref<32x32xf32, #tpu.memory_space<vmem>>, vector<32x32xf32>
    %cst = arith.constant dense<0.000000e+00> : vector<2x32xf32>
    %6 = tpu.matmul %4, %5, %cst {dimension_numbers = #tpu.dot_dimension_numbers<[1], [0], [0], [1], [0, 0, 1, 1], [], []>} : vector<2x32xf32>, vector<32x32xf32>, vector<2x32xf32> -> vector<2x32xf32>
    %7 = arith.addf %3, %6 : vector<2x32xf32>
    %c0_6 = arith.constant 0 : index
    %c0_7 = arith.constant 0 : index
    %8 = vector.load %arg8[%c0_6, %c0_7] : memref<2x32xf32, #tpu.memory_space<vmem>>, vector<2x32xf32>
    tpu.vector_store %arg8[%c0_6, %c0_7], %7 {strides = array<i32>} : memref<2x32xf32, #tpu.memory_space<vmem>>, vector<2x32xf32>,
    %c0_i32_8 = arith.constant 0 : i32
    %9 = arith.cmpi eq, %arg2, %c0_i32_8 : i32
    %10 = arith.extui %9 : i1 to i32
    %c0_i32_9 = arith.constant 0 : i32
    %11 = arith.cmpi ne, %10, %c0_i32_9 : i32
    scf.if %11 {
      %c0_10 = arith.constant 0 : index
      %c0_11 = arith.constant 0 : index
      %12 = vector.load %arg8[%c0_10, %c0_11] : memref<2x32xf32, #tpu.memory_space<vmem>>, vector<2x32xf32>
      %cst_12 = arith.constant 0.000000e+00 : f32
      %13 = vector.broadcast %cst_12 : f32 to vector<2x32xf32>
      %14 = arith.maximumf %12, %13 : vector<2x32xf32>
      %c0_13 = arith.constant 0 : index
      %c0_14 = arith.constant 0 : index
      %15 = vector.load %arg7[%c0_13, %c0_14] : memref<2x32xf32, #tpu.memory_space<vmem>>, vector<2x32xf32>
      tpu.vector_store %arg7[%c0_13, %c0_14], %14 {strides = array<i32>} : memref<2x32xf32, #tpu.memory_space<vmem>>, vector<2x32xf32>,
    } else {
    }
    return
  }
  func.func @transform_0(%arg0: i32, %arg1: i32, %arg2: i32) -> (i32, i32) {
    %c0_i32 = arith.constant 0 : i32
    return %arg1, %arg2 : i32, i32
  }
  func.func @transform_1(%arg0: i32, %arg1: i32, %arg2: i32) -> (i32, i32) {
    %c0_i32 = arith.constant 0 : i32
    return %arg2, %arg0 : i32, i32
  }
  func.func @transform_2(%arg0: i32, %arg1: i32, %arg2: i32) -> (i32, i32) {
    %c0_i32 = arith.constant 0 : i32
    %c0_i32_0 = arith.constant 0 : i32
    return %arg1, %c0_i32 : i32, i32
  }
  func.func @transform_3(%arg0: i32, %arg1: i32, %arg2: i32) -> (i32, i32) {
    %c0_i32 = arith.constant 0 : i32
    %c0_i32_0 = arith.constant 0 : i32
    return %c0_i32, %arg0 : i32, i32
  }
  func.func @transform_4(%arg0: i32, %arg1: i32, %arg2: i32) -> (i32, i32) {
    %c0_i32 = arith.constant 0 : i32
    return %arg1, %arg0 : i32, i32
  }
}

</mosaic_0001>

<bundles_post_ra>
// kernel: tpu_custom_call.1
= control target key start
LH: loop header
LB: loop body
LE: loop exit
PB: predicated region body
PF: predicated region fallthrough
CT: control target
= control target key end

     0   :  { %9 = vsyncpa [#allocation4], 0  ;;  %s424_s0 = inlined_call_operand.hbm [shape: f32[2,32], index: 0, kind: input, shape index: {}]   ;;  %s425_s1 = inlined_call_operand.hbm [shape: f32[32,32], index: 1, kind: input, shape index: {}]   ;;  %s426_s2 = inlined_call_operand.vmem [shape: f32[2,8], index: 2, kind: input, shape index: {}]   ;;  %s427_s3 = inlined_call_operand.vmem [shape: f32[8,32], index: 3, kind: input, shape index: {}]   ;;  %s428_s4 = inlined_call_operand.hbm [shape: f32[2,32], index: 4, kind: output, shape index: {}]  }
   0x1   :  { %10 = vsyncpa [#allocation7], 0 }
   0x2   :  { %11 = vsyncpa [#allocation5], 0  ;;  %s342_s15 = smov [#allocation3]   ;;  %s343_s17 = smov [#allocation6]  }
   0x3   :  { %s18_s16 = sshll.u32 %s342_s15, 4  ;;  %s27_s18 = sshll.u32 %s343_s17, 4  ;;  %s19_s16 = int_to_ptr.vmem [resolvable:$true] %s18_s16  ;;  %s375_s18 = int_to_ptr.vmem [resolvable:$true] %s27_s18 }
   0x4   :  { %s270_s21 = scalar_lea.hbm %s424_s0, 32 }
   0x5   :  { %p271_p0 = scmp.ne.s32.totalorder %s424_s0, %s270_s21  ;;  %p274_p1 = scmp.lt.u32.totalorder %s270_s21, %s424_s0 }
   0x7   :  { %p276_p2 = pnand %p274_p1, %p271_p0 }
   0x9   :  { %279 = shalt.err (!%p276_p2)
}
   0xa   :  { %s280_s26 = scalar_lea.vmem %s19_s16, 32  ;;  %p285_p4 = scmp.lt.s32.totalorder %s19_s16, %s19_s16 }
   0xb   :  { %p281_p3 = scmp.ne.s32.totalorder %s19_s16, %s280_s26  ;;  %p286_p5 = scmp.lt.s32.totalorder %s280_s26, %s280_s26 }
   0xd   :  { %p287_p6 = por %p286_p5, %p285_p4 }
   0xf   :  { %p288_p7 = pnand %p287_p6, %p281_p3 }
  0x11   :  { %291 = shalt.err (!%p288_p7)
}
  0x12   :  { %21 = dma.hbm_to_vmem [thread:$0]  %s424_s0, 32, %s19_s16, [#allocation4]  }
  0x13   :  { %s292_s5 = scalar_lea.hbm %s425_s1, 512 }
  0x14   :  { %p293_p8 = scmp.ne.s32.totalorder %s425_s1, %s292_s5  ;;  %p296_p9 = scmp.lt.u32.totalorder %s292_s5, %s425_s1 }
  0x16   :  { %p298_p10 = pnand %p296_p9, %p293_p8 }
  0x18   :  { %301 = shalt.err (!%p298_p10)
}
  0x19   :  { %s302_s10 = scalar_lea.vmem %s375_s18, 512  ;;  %p307_p12 = scmp.lt.s32.totalorder %s375_s18, %s375_s18 }
  0x1a   :  { %p303_p11 = scmp.ne.s32.totalorder %s375_s18, %s302_s10  ;;  %p308_p13 = scmp.lt.s32.totalorder %s302_s10, %s302_s10 }
  0x1c   :  { %p309_p0 = por %p308_p13, %p307_p12 }
  0x1e   :  { %p310_p1 = pnand %p309_p0, %p303_p11 }
  0x20   :  { %313 = shalt.err (!%p310_p1)
}
  0x21   :  { %s344_s0 = smov 128   ;;  %s345_s11 = smov 8  }
  0x22   :  { %33 = dma.hbm_to_vmem [thread:$0]  %s425_s1, 512, %s375_s18, [#allocation7], %s344_s0, %s344_s0, %s345_s11  }
  0x23   :  { %336 = dma.done.wait [#allocation4], 32  }
  0x24   :  { %337 = vsyncadd [#allocation4], 4294967264 }
  0x25   :  { %338 = dma.done.wait [#allocation7], 512  }
  0x26   :  { %339 = vsyncadd [#allocation7], 4294966784  ;;  %v346_v0 = vmov 0.0   ;;  %vm347_vm0 = vmmov 0   ;;  %v348_v1 = vmov 0.0|0.0   ;;  %vm50_vm1 = vcmask 64512  }
  0x27   :  { %240 = vmatprep.subr.mxu0 %v346_v0  ;;  %242 = vmatprep.mubr.msk.f32.mxu0 %vm347_vm0, %v346_v0  ;;  %v49_v2 = vld [vmem:[%s427_s3] sm:$0xff]  ;;  %v128_v4 = vld [vmem:[#allocation6] sm:$0xff]  ;;  %v129_v5 = vld [vmem:[#allocation6 + $0x8] sm:$0xff]  ;;  %vm132_vm2 = vcmask 261120   ;;  %vm124_vm3 = vcmask 254976   ;;  %s349_s1 = smov [#allocation8]  }
  0x28   :  { %256 = vmatprep.subr.bf16.mxu1 %v348_v1  ;;  %253 = vmatprep.mubr.msk.f32.mxu1 %vm347_vm0, %v346_v0  ;;  %v48_v3 = vld [vmem:[%s426_s2] sm:$0x3]  ;;  %v131_v7 = vld [vmem:[#allocation6 + $0x18] sm:$0xff]  ;;  %v257_v8 = vpack.c.bf16 %v129_v5, %v128_v4  ;;  %s221_s2 = sshll.u32 %s349_s1, 4  ;;  %s222_s2 = int_to_ptr.vmem [resolvable:$true] %s221_s2 }
  0x29   :  { %241 = vmatpush3.msra.mxu0 %v49_v2  ;;  %v130_v6 = vld [vmem:[#allocation6 + $0x10] sm:$0xff]  ;;  %v127_v10 = vld [vmem:[#allocation3] sm:$0x3]  ;;  %s314_s3 = scalar_lea.vmem %s222_s2, 32  ;;  %p319_p3 = scmp.lt.s32.totalorder %s222_s2, %s222_s2 }
  0x2a   :  { %243 = vmatmul.mubr.msk.f32.vlgmr.msra.gmra.mrb[0].mxu0 %vm50_vm1, %v48_v3  ;;  %258 = vmatpush3.bf16.msra.mxu1 %v257_v8  ;;  %v260_v9 = vpack.c.bf16 %v131_v7, %v130_v6  ;;  %p315_p2 = scmp.ne.s32.totalorder %s222_s2, %s314_s3  ;;  %p320_p4 = scmp.lt.s32.totalorder %s314_s3, %s314_s3 }
  0x2b   :  { %259 = vmatprep.subr.bf16.mxu1 %v348_v1 }
  0x2c   :  { %p321_p5 = por %p320_p4, %p319_p3 }
  0x2e   :  { %261 = vmatpush3.bf16.msra.mxu1 %v260_v9  ;;  %p322_p6 = pnand %p321_p5, %p315_p2 }
  0x31   :  { %254 = vmatmul.mubr.msk.f32.vlgmr.msra.gmra.mrb[0].mxu1 %vm132_vm2, %v127_v10 }
  0xfd   :  { %v120_v11 = vpop.f32.mrb[0].mxu0 }
  0xfe   :  { %125 = vst.msk [vmem:[#allocation2] sm:$0x3] %vm124_vm3, %v120_v11  ;;  %v244_v12 = vpop.f32.mrb[1].mxu0 }
 0x104   :  { %v202_v14 = vpop.f32.mrb[0].mxu1 }
 0x105   :  { %v126_v13 = vld [vmem:[#allocation2] sm:$0x3]  ;;  %v255_v16 = vpop.f32.mrb[1].mxu1 }
 0x106   :  { %v206_v15 = vadd.f32 %v202_v14, %v126_v13 }
 0x108   :  { %208 = vst.msk [vmem:[#allocation2] sm:$0x3] %vm124_vm3, %v206_v15 }
 0x10f   :  { %v212_v17 = vld [vmem:[#allocation2] sm:$0x3] }
 0x110   :  { %v213_v18 = vmax.f32 %v212_v17, 0.0 }
 0x112   :  { %214 = vst.msk [vmem:[#allocation8] sm:$0x3] %vm124_vm3, %v213_v18 }
 0x113   :  { %325 = shalt.err (!%p322_p6)
}
 0x114   :  { %s326_s20 = scalar_lea.hbm %s428_s4, 32 }
 0x115   :  { %p327_p7 = scmp.ne.s32.totalorder %s428_s4, %s326_s20  ;;  %p330_p8 = scmp.lt.u32.totalorder %s326_s20, %s428_s4 }
 0x117   :  { %p332_p9 = pnand %p330_p8, %p327_p7 }
 0x119   :  { %335 = shalt.err (!%p332_p9)
}
 0x11a   :  { %224 = dma.vmem_to_hbm [thread:$0]  %s222_s2, 32, %s428_s4, [#allocation5]  }
 0x11b   :  { %340 = dma.done.wait [#allocation5], 32  }
 0x11c   :  { %341 = vsyncadd [#allocation5], 4294967264 }
 0x11d   :  { %228 = vsyncpa [#allocation4], 1 }
 0x11e   :  { %229 = vsyncpa [#allocation7], 1 }
 0x11f   :  { %230 = vsyncpa [#allocation5], 1 }

</bundles_post_ra>
